<compile_context>
chip_gen: v7x
topology: tpu7x:2x2x1
jax: 0.10.0
libtpu: 0.0.40
codegen_flags: <defaults>
</compile_context>

<pallas_src>
import jax
import jax.numpy as jnp
from jax.experimental import pallas as pl
from jax.experimental.pallas import tpu as pltpu

_BN_EPS = 1e-5


def _embed_kernel(x_ref, w1_ref, b1_ref, w2_ref, b2_ref, o_ref):
    """conv1 (BN pre-folded) -> ReLU -> conv2 on one (C, tn) input tile -> (F, tn) output tile."""
    x_ct = x_ref[0]                                     # (C, tn) f32, channels in sublanes
    w1 = w1_ref[...]                                    # (F, C)  BN-folded conv1 weight
    F, n = w1.shape[0], x_ct.shape[1]

    # 1x1 conv over C channels as C broadcast-FMAs on the VPU (C is tiny & static -> unrolled).
    # TODO(synk): a stride-0 sublane-broadcast ref load (pl.ds(c, F, stride=0)) would move the
    #             per-channel broadcast into the vld instead of the XLU; left as a follow-up.
    h = jnp.broadcast_to(b1_ref[...], (F, n))           # hoisted, one broadcast per tile
    for c in range(x_ct.shape[0]):
        h = h + w1[:, c:c + 1] * x_ct[c:c + 1, :]

    h = jnp.maximum(h, 0.0)                             # ReLU

    # conv2 on the MXU; if w2 was pre-cast to bf16 in the wrapper, h follows (f32 accumulate).
    out = jnp.dot(w2_ref[...], h.astype(w2_ref.dtype),
                  preferred_element_type=jnp.float32) + b2_ref[...]
    o_ref[0] = out.astype(o_ref.dtype)                  # (F, tn), lane-dense store


def _round_up(x, m):
    return ((x + m - 1) // m) * m


def _pick_n_tile(n_pad, f, out_itemsize):
    """Largest lane-dense tile dividing n_pad under a conservative per-tile VMEM budget."""
    budget = 16 * 1024 * 1024   # fits default scoped VMEM on v5e/v6e and v7x's 64 MiB
    for t in (2048, 1024, 512, 256, 128):
        if n_pad % t == 0 and (2 * f * t * out_itemsize + 3 * f * t * 4) <= budget:
            return t
    return 128                  # n_pad is always a multiple of 128


def position_embedding_learned(xyz, params, *, out_dtype=jnp.float32, conv2_bf16=False):
    """xyz: (B, N, C) -> (B, F, N). Matches PyTorch train-mode BatchNorm1d forward."""
    w1, b1, gamma, beta, w2, b2 = params
    B, N, C = xyz.shape
    F = w1.shape[0]
    M = B * N

    x = xyz.astype(jnp.float32)
    w1 = w1.astype(jnp.float32)
    b1 = b1.astype(jnp.float32)
    w2 = w2.astype(jnp.float32)
    b2 = b2.astype(jnp.float32)

    # ---- BatchNorm batch statistics via linearity of conv1 (no stats kernel needed) ----
    x2 = x.reshape(M, C)
    mean_x = jnp.mean(x2, axis=0)                                    # (C,)
    xc = x2 - mean_x                                                 # centered -> no cancellation
    cov_x = jnp.einsum('mc,md->cd', xc, xc) / M                      # (C, C) biased covariance
    mean_h = w1 @ mean_x + b1                                        # (F,)
    var_h = jnp.maximum(jnp.einsum('fc,cd,fd->f', w1, cov_x, w1), 0.0)
    inv_std = jax.lax.rsqrt(var_h + _BN_EPS)
    scale = gamma.astype(jnp.float32) * inv_std
    shift = beta.astype(jnp.float32) - mean_h * scale

    # ---- fold BN affine into conv1 ----
    w1_eff = scale[:, None] * w1                                     # (F, C)
    b1_eff = (scale * b1 + shift).reshape(F, 1)                      # (F, 1)
    b2_col = b2.reshape(F, 1)
    w2_mm = w2.astype(jnp.bfloat16) if conv2_bf16 else w2

    # ---- layout & tiling ----
    x_t = jnp.transpose(x, (0, 2, 1))                                # tiny (B, C, N) transpose
    n_pad = _round_up(N, 128)
    if n_pad != N:
        x_t = jnp.pad(x_t, ((0, 0), (0, 0), (0, n_pad - N)))         # padded cols sliced off below
    out_itemsize = jnp.dtype(out_dtype).itemsize
    tn = _pick_n_tile(n_pad, F, out_itemsize)
    grid = (B, n_pad // tn)

    m_pad = B * n_pad
    cost = pl.CostEstimate(
        flops=m_pad * (2 * C * F + 2 * F * F + 2 * F),
        transcendentals=0,
        bytes_accessed=4 * (m_pad * C + F * C + 3 * F)
        + F * F * jnp.dtype(w2_mm.dtype).itemsize
        + m_pad * F * out_itemsize,
    )

    out = pl.pallas_call(
        _embed_kernel,
        out_shape=jax.ShapeDtypeStruct((B, F, n_pad), out_dtype),
        grid=grid,
        in_specs=[
            pl.BlockSpec((1, C, tn), lambda b, j: (b, 0, j)),
            pl.BlockSpec((F, C), lambda b, j: (0, 0)),
            pl.BlockSpec((F, 1), lambda b, j: (0, 0)),
            pl.BlockSpec((F, F), lambda b, j: (0, 0)),
            pl.BlockSpec((F, 1), lambda b, j: (0, 0)),
        ],
        out_specs=pl.BlockSpec((1, F, tn), lambda b, j: (b, 0, j)),
        compiler_params=pltpu.CompilerParams(
            dimension_semantics=("parallel", "parallel")),
        cost_estimate=cost,
    )(x_t, w1_eff, b1_eff, w2_mm, b2_col)

    if n_pad != N:
        out = out[:, :, :N]
    return out


def init_params(key, input_channel, num_pos_feats):
    """Deterministic init mirroring PyTorch defaults (kaiming-uniform-ish bounds)."""
    k1, k2, k3, k4 = jax.random.split(key, 4)
    bound1 = 1.0 / jnp.sqrt(float(input_channel))
    bound2 = 1.0 / jnp.sqrt(float(num_pos_feats))
    w1 = jax.random.uniform(k1, (num_pos_feats, input_channel), jnp.float32, -bound1, bound1)
    b1 = jax.random.uniform(k2, (num_pos_feats,), jnp.float32, -bound1, bound1)
    gamma = jnp.ones((num_pos_feats,), jnp.float32)   # BatchNorm1d weight
    beta = jnp.zeros((num_pos_feats,), jnp.float32)   # BatchNorm1d bias
    w2 = jax.random.uniform(k3, (num_pos_feats, num_pos_feats), jnp.float32, -bound2, bound2)
    b2 = jax.random.uniform(k4, (num_pos_feats,), jnp.float32, -bound2, bound2)
    return (w1, b1, gamma, beta, w2, b2)


def _reference(xyz, params):
    """Pure-JAX reference of the PyTorch forward (training-mode BN)."""
    w1, b1, gamma, beta, w2, b2 = params
    B, N, C = xyz.shape
    h = xyz.reshape(B * N, C) @ w1.T + b1
    mean = h.mean(axis=0, keepdims=True)
    var = ((h - mean) ** 2).mean(axis=0, keepdims=True)
    h = (h - mean) / jnp.sqrt(var + _BN_EPS) * gamma + beta
    h = jnp.maximum(h, 0.0)
    out = h @ w2.T + b2
    return out.reshape(B, N, -1).transpose(0, 2, 1)


if __name__ == "__main__":
    key = jax.random.PRNGKey(0)
    k_x1, k_x2, k_p = jax.random.split(key, 3)

    C_IN, F = 3, 32
    params = init_params(k_p, C_IN, F)

    # (1) lane-dense multi-tile path: N a multiple of 128, multi-batch, multi-step grid.
    B1, N1 = 2, 384
    xyz1 = jax.random.normal(k_x1, (B1, N1, C_IN), jnp.float32)
    out1 = jax.block_until_ready(position_embedding_learned(xyz1, params))
    ref1 = _reference(xyz1, params)
    assert out1.shape == (B1, F, N1), out1.shape
    err1 = float(jnp.max(jnp.abs(out1 - ref1)))
    assert jnp.allclose(out1, ref1, atol=1e-4, rtol=1e-4), err1

    # (2) padded-tail path: small N not a multiple of 128.
    B2, N2 = 2, 16
    xyz2 = jax.random.normal(k_x2, (B2, N2, C_IN), jnp.float32)
    out2 = jax.block_until_ready(position_embedding_learned(xyz2, params))
    ref2 = _reference(xyz2, params)
    assert out2.shape == (B2, F, N2), out2.shape
    err2 = float(jnp.max(jnp.abs(out2 - ref2)))
    assert jnp.allclose(out2, ref2, atol=1e-4, rtol=1e-4), err2

    print("KERNEL_OK")
</pallas_src>

<mosaic_0001>
module attributes {stable_mosaic.version = 11 : i64} {
  func.func @_embed_kernel(%arg0: i32, %arg1: i32, %arg2: memref<1x3x128xf32, #tpu.memory_space<vmem>>, %arg3: memref<32x3xf32, #tpu.memory_space<vmem>>, %arg4: memref<32x1xf32, #tpu.memory_space<vmem>>, %arg5: memref<32x32xf32, #tpu.memory_space<vmem>>, %arg6: memref<32x1xf32, #tpu.memory_space<vmem>>, %arg7: memref<1x32x128xf32, #tpu.memory_space<vmem>>) attributes {dimension_semantics = [#tpu.dimension_semantics<parallel>, #tpu.dimension_semantics<parallel>], iteration_bounds = array<i64: 2, 3>, scalar_prefetch = 0 : i64, scratch_operands = 0 : i64, tpu.core_type = #tpu.core_type<tc>, window_params = [{transform_indices = @transform_0, window_bounds = array<i64: 1, 3, 128>}, {pipeline_mode = #tpu.pipeline_mode<synchronous>, transform_indices = @transform_1, window_bounds = array<i64: 32, 3>}, {pipeline_mode = #tpu.pipeline_mode<synchronous>, transform_indices = @transform_2, window_bounds = array<i64: 32, 1>}, {pipeline_mode = #tpu.pipeline_mode<synchronous>, transform_indices = @transform_3, window_bounds = array<i64: 32, 32>}, {pipeline_mode = #tpu.pipeline_mode<synchronous>, transform_indices = @transform_4, window_bounds = array<i64: 32, 1>}, {transform_indices = @transform_5, window_bounds = array<i64: 1, 32, 128>}]} {
    %c0 = arith.constant 0 : index
    %c0_0 = arith.constant 0 : index
    %c0_1 = arith.constant 0 : index
    %0 = vector.load %arg2[%c0, %c0_0, %c0_1] : memref<1x3x128xf32, #tpu.memory_space<vmem>>, vector<1x3x128xf32>
    %1 = vector.shape_cast %0 : vector<1x3x128xf32> to vector<3x128xf32>
    %c0_2 = arith.constant 0 : index
    %c0_3 = arith.constant 0 : index
    %2 = vector.load %arg3[%c0_2, %c0_3] : memref<32x3xf32, #tpu.memory_space<vmem>>, vector<32x3xf32>
    %c0_4 = arith.constant 0 : index
    %c0_5 = arith.constant 0 : index
    %3 = vector.load %arg4[%c0_4, %c0_5] : memref<32x1xf32, #tpu.memory_space<vmem>>, vector<32x1xf32>
    %4 = vector.shape_cast %3 : vector<32x1xf32> to vector<32x1xf32>
    %5 = vector.broadcast %4 : vector<32x1xf32> to vector<32x128xf32>
    %6 = vector.extract_strided_slice %2 {offsets = [0, 0], sizes = [32, 1], strides = [1, 1]} : vector<32x3xf32> to vector<32x1xf32>
    %7 = vector.extract_strided_slice %1 {offsets = [0, 0], sizes = [1, 128], strides = [1, 1]} : vector<3x128xf32> to vector<1x128xf32>
    %8 = vector.broadcast %6 : vector<32x1xf32> to vector<32x128xf32>
    %9 = vector.broadcast %7 : vector<1x128xf32> to vector<32x128xf32>
    %10 = arith.mulf %8, %9 : vector<32x128xf32>
    %11 = arith.addf %5, %10 : vector<32x128xf32>
    %12 = vector.extract_strided_slice %2 {offsets = [0, 1], sizes = [32, 1], strides = [1, 1]} : vector<32x3xf32> to vector<32x1xf32>
    %13 = vector.extract_strided_slice %1 {offsets = [1, 0], sizes = [1, 128], strides = [1, 1]} : vector<3x128xf32> to vector<1x128xf32>
    %14 = vector.broadcast %12 : vector<32x1xf32> to vector<32x128xf32>
    %15 = vector.broadcast %13 : vector<1x128xf32> to vector<32x128xf32>
    %16 = arith.mulf %14, %15 : vector<32x128xf32>
    %17 = arith.addf %11, %16 : vector<32x128xf32>
    %18 = vector.extract_strided_slice %2 {offsets = [0, 2], sizes = [32, 1], strides = [1, 1]} : vector<32x3xf32> to vector<32x1xf32>
    %19 = vector.extract_strided_slice %1 {offsets = [2, 0], sizes = [1, 128], strides = [1, 1]} : vector<3x128xf32> to vector<1x128xf32>
    %20 = vector.broadcast %18 : vector<32x1xf32> to vector<32x128xf32>
    %21 = vector.broadcast %19 : vector<1x128xf32> to vector<32x128xf32>
    %22 = arith.mulf %20, %21 : vector<32x128xf32>
    %23 = arith.addf %17, %22 : vector<32x128xf32>
    %cst = arith.constant 0.000000e+00 : f32
    %24 = vector.broadcast %cst : f32 to vector<32x128xf32>
    %25 = arith.maximumf %23, %24 : vector<32x128xf32>
    %c0_6 = arith.constant 0 : index
    %c0_7 = arith.constant 0 : index
    %26 = vector.load %arg5[%c0_6, %c0_7] : memref<32x32xf32, #tpu.memory_space<vmem>>, vector<32x32xf32>
    %cst_8 = arith.constant dense<0.000000e+00> : vector<32x128xf32>
    %27 = tpu.matmul %26, %25, %cst_8 {dimension_numbers = #tpu.dot_dimension_numbers<[1], [0], [0], [1], [0, 0, 1, 1], [], []>} : vector<32x32xf32>, vector<32x128xf32>, vector<32x128xf32> -> vector<32x128xf32>
    %c0_9 = arith.constant 0 : index
    %c0_10 = arith.constant 0 : index
    %28 = vector.load %arg6[%c0_9, %c0_10] : memref<32x1xf32, #tpu.memory_space<vmem>>, vector<32x1xf32>
    %29 = vector.broadcast %28 : vector<32x1xf32> to vector<32x128xf32>
    %30 = arith.addf %27, %29 : vector<32x128xf32>
    %c0_11 = arith.constant 0 : index
    %c0_12 = arith.constant 0 : index
    %c0_13 = arith.constant 0 : index
    %31 = vector.load %arg7[%c0_11, %c0_12, %c0_13] : memref<1x32x128xf32, #tpu.memory_space<vmem>>, vector<1x32x128xf32>
    %32 = vector.shape_cast %31 : vector<1x32x128xf32> to vector<32x128xf32>
    %33 = vector.shape_cast %30 : vector<32x128xf32> to vector<1x32x128xf32>
    tpu.vector_store %arg7[%c0_11, %c0_12, %c0_13], %33 {strides = array<i32>} : memref<1x32x128xf32, #tpu.memory_space<vmem>>, vector<1x32x128xf32>,
    return
  }
  func.func @transform_0(%arg0: i32, %arg1: i32) -> (i32, i32, i32) {
    %c0_i32 = arith.constant 0 : i32
    %c0_i32_0 = arith.constant 0 : i32
    return %arg0, %c0_i32, %arg1 : i32, i32, i32
  }
  func.func @transform_1(%arg0: i32, %arg1: i32) -> (i32, i32) {
    %c0_i32 = arith.constant 0 : i32
    %c0_i32_0 = arith.constant 0 : i32
    %c0_i32_1 = arith.constant 0 : i32
    return %c0_i32, %c0_i32_0 : i32, i32
  }
  func.func @transform_2(%arg0: i32, %arg1: i32) -> (i32, i32) {
    %c0_i32 = arith.constant 0 : i32
    %c0_i32_0 = arith.constant 0 : i32
    %c0_i32_1 = arith.constant 0 : i32
    return %c0_i32, %c0_i32_0 : i32, i32
  }
  func.func @transform_3(%arg0: i32, %arg1: i32) -> (i32, i32) {
    %c0_i32 = arith.constant 0 : i32
    %c0_i32_0 = arith.constant 0 : i32
    %c0_i32_1 = arith.constant 0 : i32
    return %c0_i32, %c0_i32_0 : i32, i32
  }
  func.func @transform_4(%arg0: i32, %arg1: i32) -> (i32, i32) {
    %c0_i32 = arith.constant 0 : i32
    %c0_i32_0 = arith.constant 0 : i32
    %c0_i32_1 = arith.constant 0 : i32
    return %c0_i32, %c0_i32_0 : i32, i32
  }
  func.func @transform_5(%arg0: i32, %arg1: i32) -> (i32, i32, i32) {
    %c0_i32 = arith.constant 0 : i32
    %c0_i32_0 = arith.constant 0 : i32
    return %arg0, %c0_i32, %arg1 : i32, i32, i32
  }
}

</mosaic_0001>

<bundles_post_ra>
// kernel: tpu_custom_call.1
= control target key start
LH: loop header
LB: loop body
LE: loop exit
PB: predicated region body
PF: predicated region fallthrough
CT: control target
= control target key end

     0   :  { %10 = vsyncpa [#allocation3], 0  ;;  %s1060_s0 = inlined_call_operand.vmem [shape: f32[2,3,384], index: 0, kind: input, shape index: {}]   ;;  %s1061_s1 = inlined_call_operand.vmem [shape: f32[32,3], index: 1, kind: input, shape index: {}]   ;;  %s1062_s2 = inlined_call_operand.vmem [shape: f32[32,1], index: 2, kind: input, shape index: {}]   ;;  %s1063_s3 = inlined_call_operand.vmem [shape: f32[32,32], index: 3, kind: input, shape index: {}]   ;;  %s1064_s4 = inlined_call_operand.vmem [shape: f32[32,1], index: 4, kind: input, shape index: {}]   ;;  %s1065_s5 = inlined_call_operand.hbm [shape: f32[2,32,384], index: 5, kind: output, shape index: {}]  }
   0x1   :  { %12 = vsyncpa [#allocation3 + $0x1], 0  ;;  %s868_s18 = smov 0   ;;  %s870_s19 = smov 0  }
   0x2   :  { %s872_s20 = smov 0   ;;  %s874_s21 = smov 0  }
   0x3   :  { %s876_s22 = smov 0   ;;  %s878_s23 = smov 0  }
   0x4   :  { %s880_s24 = smov 0   ;;  %s882_s25 = smov 0  }
   0x5 LB: > { %s595_s26 = sadd.s32 4294967295, %s829_s25   ;;  %s596_s27 = sadd.s32 4294967294, %s829_s25   ;;  %s829_s25 = sphi %s882_s25, %s18_s25   ;;  %s825_s24 = sphi %s880_s24, %s1074_s24   ;;  %s821_s23 = sphi %s878_s23, %s1073_s23   ;;  %s817_s22 = sphi %s876_s22, %s1072_s22   ;;  %s813_s21 = sphi %s874_s21, %s1071_s21   ;;  %s809_s20 = sphi %s872_s20, %s1070_s20   ;;  %s805_s19 = sphi %s870_s19, %s1069_s19   ;;  %s801_s18 = sphi %s868_s18, %s1068_s18  }
   0x6   : > { %s27_s28 = sadd.s32 1, %s821_s23  ;;  %s30_s29 = sadd.s32 1, %s825_s24 }
   0x7   : > { %p28_p0 = scmp.ge.s32.totalorder %s27_s28, 3  ;;  %p161_p1 = scmp.ne.s32.totalorder %s809_s20, %s805_s19 }
   0x8   : > { %p162_p2 = scmp.eq.s32.totalorder %s595_s26, 5  ;;  %p167_p5 = scmp.ne.s32.totalorder %s805_s19, %s801_s18 }
   0x9   : > { %s1076_s28 = smov (%p28_p0, %s27_s28), 0  ;;  %s1078_s29 = smov (!%p28_p0, %s30_s29), %s825_s24 }
   0xa   : > { %s147_s30 = ssub.s32 %s821_s23, %s1076_s28  ;;  %p919_p3 = por %p162_p2, %p161_p1 }
   0xb   : > { %p32_p4 = scmp.ge.s32.totalorder %s1078_s29, 2  ;;  %p168_p6 = scmp.eq.s32.totalorder %s596_s27, 5 }
   0xc   : > { %p599_p7 = scmp.ge.s32.totalorder %s829_s25, 1  ;;  %p209_p9 = scmp.lt.s32.totalorder %s829_s25, 7 }
   0xd   : > { %s1080_s29 = smov (%p32_p4, %s1078_s29), 0  ;;  %p928_p8 = por %p168_p6, %p167_p5 }
   0xe   : > { %s146_s8 = ssub.s32 %s825_s24, %s1080_s29  ;;  %s151_s9 = sadd.s32 1, %s809_s20 }
   0xf   : > { %s148_s10 = sor.u32 %s147_s30, %s146_s8  ;;  %p210_p10 = pnand %p599_p7, %p209_p9 }
  0x10   : > { %p149_p11 = scmp.eq.s32.totalorder %s148_s10, 0  ;;  %v253_v0 = vld [vmem:[%s1062_s2] sm:$0xff] (!%p210_p10)  ;;  %v831_v2 = vmov (!%p210_p10), 0   ;;  %v254_v3 = vld [vmem:[%s1062_s2 + $0x8] sm:$0xff] (!%p210_p10)  ;;  %v252_v5 = vld [vmem:[%s1061_s1 + $0x18] sm:$0xff] (!%p210_p10)  ;;  %v832_v6 = vmov (!%p210_p10), 1   ;;  %v297_v17 = vlaneseq (!%p210_p10) }
  0x11   : > { %213 = sbr.rel (%p210_p10) target bundleno = 428 (0x1ac), region = 40  ;;  %v249_v1 = vld [vmem:[%s1061_s1] sm:$0xff] (!%p210_p10)  ;;  %724 = vset.pattern.permute.xlu1 (!%p210_p10), %v831_v2  ;;  %723 = vset.pattern.permute.xlu0 (!%p210_p10), %v831_v2  ;;  %v250_v4 = vld [vmem:[%s1061_s1 + $0x8] sm:$0xff] (!%p210_p10)  ;;  %v255_v7 = vld [vmem:[%s1062_s2 + $0x10] sm:$0xff] (!%p210_p10)  ;;  %v833_v9 = vmov (!%p210_p10), 2   ;;  %vm397_vm0 = vcmask (!%p210_p10), 261120  }
  0x12   : > { %s937_s11 = scalar_select %p149_p11, %s809_s20, %s151_s9  }
  0x13   : > { %259 = vperm.xlu1 (!%p210_p10), %724, %v253_v0   ;;  %279 = vperm.xlu0 (!%p210_p10), %723, %v249_v1   ;;  %v251_v8 = vld [vmem:[%s1061_s1 + $0x10] sm:$0xff] (!%p210_p10)  ;;  %v256_v10 = vld [vmem:[%s1062_s2 + $0x18] sm:$0xff] (!%p210_p10)  ;;  %v369_v11 = vld [vmem:[%s1063_s3] sm:$0xff] (!%p210_p10)  ;;  %p240_p12 = scmp.lt.s32.totalorder (!%p210_p10), %s817_s22, 1  ;;  %p242_p13 = scmp.lt.s32.totalorder (!%p210_p10), %s813_s21, 2  ;;  %v298_v20 = vshrl.u32 (!%p210_p10), %v297_v17, 7 }
  0x14   : > { %v371_v12 = vld [vmem:[%s1063_s3 + $0x10] sm:$0xff] (!%p210_p10)  ;;  %626 = vmatprep.mubr.msk.f32.mxu0 (!%p210_p10), %vm397_vm0, %v369_v11  ;;  %v373_v13 = vld [vmem:[%s1064_s4] sm:$0xff] (!%p210_p10)  ;;  %v374_v15 = vld [vmem:[%s1064_s4 + $0x8] sm:$0xff] (!%p210_p10)  ;;  %s834_s14 = smov (!%p210_p10), [#allocation2]  }
  0x15   : > { %629 = vmatprep.mubr.msk.f32.mxu1 (!%p210_p10), %vm397_vm0, %v371_v12  ;;  %v375_v14 = vld [vmem:[%s1064_s4 + $0x10] sm:$0xff] (!%p210_p10)  ;;  %v376_v16 = vld [vmem:[%s1064_s4 + $0x18] sm:$0xff] (!%p210_p10)  ;;  %v299_v23 = vsub.s32 (!%p210_p10), 0, %v298_v20  ;;  %v327_v28 = vsub.s32 (!%p210_p10), 1, %v298_v20  ;;  %v355_v30 = vsub.s32 (!%p210_p10), 2, %v298_v20  ;;  %s739_s15 = sshll.u32 (!%p210_p10), %s834_s14, 4  ;;  %s740_s15 = int_to_ptr.vmem [resolvable:$false] %s739_s15 }
  0x17   : > { %264 = vperm.xlu1 (!%p210_p10), %724, %v254_v3   ;;  %284 = vperm.xlu0 (!%p210_p10), %723, %v250_v4  }
  0x18   : > { %s241_s16 = scalar_select %p240_p12, %s817_s22, 1 }
  0x19   : > { %s243_s17 = scalar_select %p242_p13, %s813_s21, 2 }
  0x1a   : > { %s644_s26 = smul.u32 3, %s241_s16  ;;  %s237_s16 = sand.u32 1, %s805_s19  }
  0x1b   : > { %725 = vset.pattern.permute.xlu1 %v832_v6  ;;  %294 = vperm.xlu0 %723, %v252_v5   ;;  %s1008_s12 = scalar_lea.sflag [#allocation3], %s237_s16 }
  0x1c   : > { %314 = vperm.xlu1 %725, %v250_v4   ;;  %s245_s27 = sadd.s32 %s644_s26, %s243_s17  ;;  %s600_s17 = sshll.u32 %s237_s16, 5 }
  0x1d   : > { %s601_s30 = sshll.u32 %s245_s27, 2  ;;  %s645_s26 = smul.u32 12, %s817_s22 }
  0x1e   : > { %s247_s10 = scalar_lea.vmem %s1060_s0, %s601_s30  ;;  %s239_s30 = scalar_lea.vmem [#allocation2], %s600_s17 }
  0x1f   : > { %269 = vperm.xlu0 %723, %v255_v7   ;;  %v248_v24 = vld [vmem:[%s247_s10] sm:$0x7]  ;;  %s511_s27 = sadd.s32 %s813_s21, %s645_s26  ;;  %s514_s8 = sshll.u32 %s239_s30, 4  ;;  %s1001_s8 = int_to_ptr.vmem [resolvable:$true] %s514_s8 }
  0x20   : > { %726 = vset.pattern.permute.xlu1 %v831_v2  ;;  %v300_v27 = vrot.slane %v248_v24, %v299_v23  ;;  %v328_v33 = vrot.slane %v248_v24, %v327_v28  ;;  %v356_v34 = vrot.slane %v248_v24, %v355_v30  ;;  %s607_s9 = sshll.u32 %s511_s27, 7  ;;  %s735_s13 = scalar_lea.vmem %s1001_s8, 512 }
  0x21   : > { %289 = vperm.xlu1 %726, %v251_v8   ;;  %s1006_s21 = scalar_lea.hbm %s1065_s5, %s607_s9  ;;  %p736_p0 = scmp.ne.s32.totalorder %s1001_s8, %s735_s13 }
  0x22   : > { %s741_s17 = scalar_lea.vmem %s740_s15, 1024  ;;  %p742_p4 = scmp.lt.s32.totalorder %s1001_s8, %s740_s15 }
  0x23   : > { %728 = vset.pattern.permute.xlu0 %v832_v6  ;;  %p737_p1 = pnand %p736_p0, %p919_p3  ;;  %p743_p5 = scmp.lt.s32.totalorder %s741_s17, %s735_s13 }
  0x24   : > { %310 = vperm.xlu0 %728, %v249_v1  }
  0x25   : > { %727 = vset.pattern.permute.xlu1 %v833_v9  ;;  %p738_p2 = pneg %p737_p1  ;;  %p744_p6 = por %p743_p5, %p742_p4 }
  0x26   : > { %338 = vperm.xlu1 %727, %v249_v1  }
  0x27   : > { %p745_p7 = pnand %p744_p6, %p738_p2 }
  0x28   : > { %318 = vperm.xlu0 %728, %v251_v8  }
  0x2a   : > { %342 = vperm.xlu1 %727, %v250_v4  }
  0x2c   : > { %732 = vset.pattern.permute.xlu0 %v833_v9 }
  0x2d   : > { %350 = vperm.xlu0 %732, %v252_v5  }
  0x2e   : > { %729 = vset.pattern.permute.xlu1 %v831_v2 }
  0x2f   : > { %274 = vperm.xlu1 %729, %v256_v10  }
  0x31   : > { %734 = vset.pattern.permute.xlu0 %v831_v2 }
  0x32   : > { %389 = vperm.xlu0 %734, %v375_v14  }
  0x33   : > { %730 = vset.pattern.permute.xlu1 %v832_v6 }
  0x34   : > { %322 = vperm.xlu1 %730, %v252_v5  }
  0x38   : > { %731 = vset.pattern.permute.xlu1 %v833_v9  ;;  %v372_v9 = vld [vmem:[%s1063_s3 + $0x18] sm:$0xff] }
  0x39   : > { %346 = vperm.xlu1 %731, %v251_v8   ;;  %v370_v8 = vld [vmem:[%s1063_s3 + $0x8] sm:$0xff] }
  0x3d   : > { %733 = vset.pattern.permute.xlu1 %v831_v2 }
  0x3e   : > { %379 = vperm.xlu1 %733, %v373_v13  }
  0x42   : > { %384 = vperm.xlu1 %733, %v374_v15  }
  0x46   : > { %394 = vperm.xlu1 %733, %v376_v16  }
  0x92   : > { %v260_v18 = vpop.permute.xlu1 %259  ;;  %v280_v19 = vpop.permute.xlu0 %279 }
  0x93   : > { %v301_v31 = vmul.f32 %v300_v27, %v280_v19 }
  0x95   : > { %v305_v36 = vadd.f32 %v301_v31, %v260_v18 }
  0x96   : > { %v265_v21 = vpop.permute.xlu1 %264  ;;  %v285_v22 = vpop.permute.xlu0 %284 }
  0x97   : > { %v302_v37 = vmul.f32 %v300_v27, %v285_v22 }
  0x99   : > { %v306_v43 = vadd.f32 %v302_v37, %v265_v21 }
  0x9a   : > { %v295_v25 = vpop.permute.xlu0 %294 }
  0x9b   : > { %v315_v26 = vpop.permute.xlu1 %314  ;;  %v304_v54 = vmul.f32 %v300_v27, %v295_v25 }
  0x9c   : > { %v330_v40 = vmul.f32 %v328_v33, %v315_v26 }
  0x9e   : > { %v270_v29 = vpop.permute.xlu0 %269  ;;  %v334_v45 = vadd.f32 %v330_v40, %v306_v43 }
  0xa0   : > { %v290_v32 = vpop.permute.xlu1 %289 }
  0xa1   : > { %v303_v56 = vmul.f32 %v300_v27, %v290_v32 }
  0xa3   : > { %v311_v35 = vpop.permute.xlu0 %310  ;;  %v307_v63 = vadd.f32 %v303_v56, %v270_v29 }
  0xa4   : > { %v329_v38 = vmul.f32 %v328_v33, %v311_v35 }
  0xa5   : > { %v339_v39 = vpop.permute.xlu1 %338 }
  0xa6   : > { %v333_v41 = vadd.f32 %v329_v38, %v305_v36  ;;  %v357_v42 = vmul.f32 %v356_v34, %v339_v39 }
  0xa7   : > { %v319_v50 = vpop.permute.xlu0 %318 }
  0xa8   : > { %v361_v46 = vadd.f32 %v357_v42, %v333_v41  ;;  %v331_v60 = vmul.f32 %v328_v33, %v319_v50 }
  0xa9   : > { %v343_v44 = vpop.permute.xlu1 %342 }
  0xaa   : > { %v358_v47 = vmul.f32 %v356_v34, %v343_v44  ;;  %v365_v49 = vmax.f32 %v361_v46, 0.0  ;;  %v335_v1 = vadd.f32 %v331_v60, %v307_v63 }
  0xac   : > { %v362_v48 = vadd.f32 %v358_v47, %v334_v45  ;;  %v351_v55 = vpop.permute.xlu0 %350 }
  0xad   : > { %v360_v61 = vmul.f32 %v356_v34, %v351_v55 }
  0xae   : > { %v366_v51 = vmax.f32 %v362_v48, 0.0  ;;  %v275_v52 = vpop.permute.xlu1 %274 }
  0xaf   : > { %v308_v58 = vadd.f32 %v304_v54, %v275_v52 }
  0xb0   : > { %v632_v53 = vpack.c.bf16 %v366_v51, %v365_v49 }
  0xb1   : > { %v390_v13 = vpop.permute.xlu0 %389 }
  0xb2   : > { %633 = vmatprep.subr.bf16.mxu0 %v632_v53  ;;  %640 = vmatprep.subr.bf16.mxu1 %v632_v53 }
  0xb3   : > { %v323_v57 = vpop.permute.xlu1 %322  ;;  %635 = vmatpush3.bf16.msra.mxu0 %v632_v53  ;;  %642 = vmatpush3.bf16.msra.mxu1 %v632_v53 }
  0xb4   : > { %v332_v59 = vmul.f32 %v328_v33, %v323_v57 }
  0xb6   : > { %v336_v62 = vadd.f32 %v332_v59, %v308_v58 }
  0xb8   : > { %v347_v0 = vpop.permute.xlu1 %346  ;;  %v364_v2 = vadd.f32 %v360_v61, %v336_v62 }
  0xb9   : > { %v359_v3 = vmul.f32 %v356_v34, %v347_v0 }
  0xba   : > { %v368_v5 = vmax.f32 %v364_v2, 0.0 }
  0xbb   : > { %v363_v4 = vadd.f32 %v359_v3, %v335_v1 }
  0xbd   : > { %v367_v6 = vmax.f32 %v363_v4, 0.0  ;;  %v380_v10 = vpop.permute.xlu1 %379 }
  0xbf   : > { %v636_v7 = vpack.c.bf16 %v368_v5, %v367_v6 }
  0xc1   : > { %637 = vmatprep.subr.bf16.mxu0 %v636_v7  ;;  %641 = vmatprep.subr.bf16.mxu1 %v636_v7  ;;  %v385_v11 = vpop.permute.xlu1 %384 }
  0xc2   : > { %639 = vmatpush3.bf16.msra.mxu0 %v636_v7  ;;  %643 = vmatpush3.bf16.msra.mxu1 %v636_v7 }
  0xc5   : > { %627 = vmatmul.mubr.msk.f32.vlgmr.msra.gmra.mrb[0].mxu0 %vm397_vm0, %v370_v8  ;;  %630 = vmatmul.mubr.msk.f32.vlgmr.msra.gmra.mrb[0].mxu1 %vm397_vm0, %v372_v9  ;;  %v395_v12 = vpop.permute.xlu1 %394 }
 0x198   : > { %v628_v14 = vpop.f32.mrb[0].mxu0  ;;  %v631_v15 = vpop.f32.mrb[0].mxu1 }
 0x199   : > { %v482_v16 = vadd.f32 %v628_v14, %v385_v11  ;;  %v492_v17 = vadd.f32 %v631_v15, %v395_v12  ;;  %v476_v18 = vpop.f32.mrb[1].mxu0  ;;  %v486_v19 = vpop.f32.mrb[1].mxu1 }
 0x19a   : > { %v477_v20 = vadd.f32 %v476_v18, %v380_v10  ;;  %v487_v21 = vadd.f32 %v486_v19, %v390_v13 }
 0x19b   : > { %496 = vst [vmem:[%s239_s30 + $0x8] sm:$0xff] %v482_v16  ;;  %498 = vst [vmem:[%s239_s30 + $0x18] sm:$0xff] %v492_v17 }
 0x19c   : > { %495 = vst [vmem:[%s239_s30] sm:$0xff] %v477_v20  ;;  %497 = vst [vmem:[%s239_s30 + $0x10] sm:$0xff] %v487_v21 }
 0x19d   : > { %748 = shalt.err (!%p745_p7)
}
 0x19e   : > { %s749_s16 = scalar_lea.hbm %s1006_s21, 512  ;;  %s753_s30 = scalar_lea.hbm %s1065_s5, 3072 }
 0x19f   : > { %p750_p9 = scmp.ne.s32.totalorder %s1006_s21, %s749_s16  ;;  %p754_p12 = scmp.lt.u32.totalorder %s1006_s21, %s1065_s5 }
 0x1a0   : > { %p755_p13 = scmp.lt.u32.totalorder %s753_s30, %s749_s16  ;;  %p757_p1 = scmp.lt.u32.totalorder %s749_s16, %s1006_s21 }
 0x1a1   : > { %p751_p10 = pnand %p750_p9, %p919_p3 }
 0x1a2   : > { %p756_p0 = por %p755_p13, %p754_p12 }
 0x1a3   : > { %p752_p11 = pneg %p751_p10 }
 0x1a4   : > { %p758_p2 = por %p757_p1, %p756_p0 }
 0x1a6   : > { %p759_p4 = pnand %p758_p2, %p752_p11 }
 0x1a8   : > { %762 = shalt.err (!%p759_p4)
}
 0x1a9   : > { %s835_s22 = smov 128   ;;  %s836_s13 = smov 384  }
 0x1aa   : > { %s837_s14 = smov 8  }
 0x1ab   : > { %646 = dma.vmem_to_hbm [thread:$0]  (%p919_p3), %s1001_s8, 512, %s1006_s21, %s1008_s12, %s835_s22, %s836_s13, %s837_s14  }
 0x1ac PF: > { %p652_p5 = scmp.ge.s32.totalorder %s829_s25, 2  ;;  %s529_s15 = sand.u32 1, %s801_s18  }
 0x1ad   : > { %s530_s17 = scalar_lea.sflag [#allocation3], %s529_s15 }
 0x1ae   : > { %p649_p6 = pnand %p652_p5, %p928_p8 }
 0x1b0   : > { %796 = dma.done.wait (!%p649_p6), %s530_s17, 512  }
 0x1b1   : > { %798 = vsyncadd (!%p649_p6), %s530_s17, 4294966784  ;;  %s18_s25 = sadd.s32 1, %s829_s25   ;;  %s1068_s18 = smov %s805_s19 }
 0x1b2   : > { %p15_p7 = scmp.ge.s32.totalorder %s18_s25, 8   ;;  %s1069_s19 = smov %s809_s20 }
 0x1b3   : > { %s1070_s20 = smov %s937_s11  ;;  %s1071_s21 = smov %s821_s23 }
 0x1b4   : > { %s1072_s22 = smov %s825_s24  ;;  %s1073_s23 = smov %s1076_s28 }
 0x1b5   : > { %s1074_s24 = smov %s1080_s29  ;;  %17 = sbr.rel (!%p15_p7) target bundleno = 5 (0x5), region = 75 }
 0x1bc   :  { %535 = vsyncpa [#allocation3], 1 }
 0x1bd   :  { %537 = vsyncpa [#allocation3 + $0x1], 1 }

</bundles_post_ra>
